<compile_context>
chip_gen: v7x
topology: tpu7x:2x2x1
jax: 0.10.0
libtpu: 0.0.40
codegen_flags: <defaults>
</compile_context>

<pallas_src>
import functools

import jax
import jax.numpy as jnp
from jax import lax
from jax.experimental import pallas as pl
from jax.experimental.pallas import tpu as pltpu

_MIB = 1024 * 1024


def _tpu_generation():
    """Best-effort TPU generation (5 / 6 / 7); None if unknown."""
    try:
        kind = jax.devices()[0].device_kind.lower()
    except Exception:
        return None
    for g in (7, 6, 5):
        if f"v{g}" in kind:
            return g
    return None


def _vmem_budget(gen):
    """(target bytes per input per block, explicit scoped-VMEM limit)."""
    if gen == 7:   # ~3.2 TB/s HBM, 64 MiB physical VMEM per TC
        return 6 * _MIB, 48 * _MIB
    if gen == 6:   # ~1.4 TB/s HBM, 128 MiB physical VMEM
        return 4 * _MIB, 48 * _MIB
    if gen == 5:   # ~0.82 TB/s HBM, 16 MiB default scoped limit -> bump it
        return 2 * _MIB, 32 * _MIB
    return 2 * _MIB, 32 * _MIB  # conservative fallback


def _round_up(x, m):
    return ((x + m - 1) // m) * m


def _choose_tile_rows(n_rows, row_bytes, sublane, target_bytes):
    """Rows per block: HBM-streaming-sized, sublane-aligned, >= 4 grid steps."""
    rows = (target_bytes // max(1, row_bytes)) // sublane * sublane
    rows = max(sublane, rows)
    # Keep at least 4 grid steps so both v7x TensorCores stay fed and the
    # double-buffered pipeline has something to overlap.
    cap = _round_up(pl.cdiv(n_rows, 4), sublane)
    rows = min(rows, cap)
    if rows >= n_rows:
        return n_rows  # single full-extent block (always layout-legal)
    return int(rows)


def _partial_sq_sum_kernel(pred_ref, gt_ref, out_ref, *, tile_rows, valid_rows,
                           need_mask):
    # Upcast in-kernel (VPU), square, reduce.  Block is either
    # (tile_rows, HW) or lane-dense (tile_rows, HW//128, 128).
    diff = pred_ref[...].astype(jnp.float32) - gt_ref[...].astype(jnp.float32)
    sq = diff * diff
    if sq.ndim == 3:
        part = jnp.sum(sq, axis=1)                    # (tile_rows, 128) dense
    else:
        part = jnp.sum(sq, axis=-1, keepdims=True)    # (tile_rows, 1)
    if need_mask:
        # Cheap post-reduction select (only the last block is partial; padded
        # rows may carry unspecified data, so zero them on the tiny partials).
        row0 = pl.program_id(0) * tile_rows
        rows = row0 + lax.broadcasted_iota(jnp.int32, part.shape, 0)
        part = jnp.where(rows < valid_rows, part, 0.0)
    out_ref[...] = part


def _row_sq_sums(pred2d, gt2d):
    """S[r] = sum_hw (pred[r] - gt[r])^2 for the (n_rows, HW) inputs."""
    n_rows, hw = pred2d.shape
    itemsize = jnp.dtype(pred2d.dtype).itemsize
    sublane = max(8, 32 // itemsize)       # f32: 8, bf16: 16, int8/fp8: 32
    target_bytes, vmem_limit = _vmem_budget(_tpu_generation())
    tile_rows = _choose_tile_rows(n_rows, hw * itemsize, sublane, target_bytes)
    num_tiles = pl.cdiv(n_rows, tile_rows)
    need_mask = (n_rows % tile_rows) != 0

    # Lane-dense output path: needs HW % 128 == 0 and HW/128 a multiple of 8
    # (so the (rows, HW/128, 128) view stays sublane-dense with contiguous DMA).
    lane_dense = (hw % 128 == 0) and ((hw // 128) % 8 == 0)
    if lane_dense:
        c = hw // 128
        pred_in = pred2d.reshape(n_rows, c, 128)   # free contiguous reshape
        gt_in = gt2d.reshape(n_rows, c, 128)
        in_block = (tile_rows, c, 128)
        in_map = lambda i: (i, 0, 0)
        out_cols = 128
    else:
        pred_in, gt_in = pred2d, gt2d
        in_block = (tile_rows, hw)
        in_map = lambda i: (i, 0)
        out_cols = 1

    kernel = functools.partial(_partial_sq_sum_kernel, tile_rows=tile_rows,
                               valid_rows=n_rows, need_mask=need_mask)
    partials = pl.pallas_call(
        kernel,
        out_shape=jax.ShapeDtypeStruct((n_rows, out_cols), jnp.float32),
        grid=(num_tiles,),
        in_specs=[pl.BlockSpec(in_block, in_map),
                  pl.BlockSpec(in_block, in_map)],
        out_specs=pl.BlockSpec((tile_rows, out_cols), lambda i: (i, 0)),
        compiler_params=pltpu.CompilerParams(
            dimension_semantics=("parallel",),   # no cross-step accumulation
            vmem_limit_bytes=vmem_limit),
    )(pred_in, gt_in)

    if lane_dense:
        return jnp.sum(partials, axis=-1)    # tiny (n_rows, 128) -> (n_rows,)
    return partials[:, 0]


def joints_mse_loss(output, target, target_weight=None):
    """Pallas TPU equivalent of the PyTorch joints_mse_loss forward."""
    B, J, H, W = output.shape
    HW = H * W

    # Free reshapes of the contiguous NCHW tensors; no transpose, no cast.
    pred = output.reshape(B * J, HW)
    gt = target.reshape(B * J, HW)

    # S[b, j] = sum_hw (pred - gt)^2, computed per row by the kernel.
    row_sums = _row_sq_sums(pred, gt).reshape(B, J)

    if target_weight is None:
        w_sq_sum = jnp.full((J,), float(B), jnp.float32)   # sum_b 1^2 == B
    else:
        tw = target_weight.reshape(B, J).astype(jnp.float32)
        w_sq_sum = jnp.sum(tw * tw, axis=0)                 # W_j, shape (J,)

    scale = 0.5 / (J * B * B * HW)
    return scale * jnp.sum(row_sums * w_sq_sum[None, :])


class JointsMSELoss:
    def __init__(self, use_target_weight=True):
        self.use_target_weight = use_target_weight

    def __call__(self, output, target, target_weight):
        if not self.use_target_weight:
            target_weight = None
        return joints_mse_loss(output, target, target_weight)


def _ref_loss(output, target, target_weight):
    """Pure-JAX emulation of the exact PyTorch forward (incl. broadcast quirk)."""
    B, J = output.shape[0], output.shape[1]
    pred = output.reshape(B, J, -1)
    gt = target.reshape(B, J, -1)
    loss = 0.0
    for idx in range(J):
        hp = pred[:, idx:idx + 1, :]            # (B, 1, HW)
        hg = gt[:, idx:idx + 1, :]
        if target_weight is None:
            loss += 0.5 * jnp.mean((hp - hg) ** 2)
        else:
            tw = target_weight[:, idx]          # (B, 1) -> broadcasts to (B, B, HW)
            loss += 0.5 * jnp.mean((hp * tw - hg * tw) ** 2)
    return loss / J


if __name__ == "__main__":
    key = jax.random.PRNGKey(0)
    k1, k2, k3, k4, k5, k6 = jax.random.split(key, 6)

    # Case 1: f32, HW = 256 (exercises the (tile_rows, 1) fallback output path).
    B, J, H, W = 2, 4, 16, 16
    output = jax.random.normal(k1, (B, J, H, W), jnp.float32)
    target = jax.random.normal(k2, (B, J, H, W), jnp.float32)
    target_weight = jax.random.uniform(k3, (B, J, 1), jnp.float32)

    loss_w = JointsMSELoss(use_target_weight=True)(output, target, target_weight)
    jax.block_until_ready(loss_w)
    ref_w = _ref_loss(output, target, target_weight)
    assert abs(float(loss_w) - float(ref_w)) < 1e-5 * max(1.0, abs(float(ref_w))), (
        float(loss_w), float(ref_w))

    loss_nw = JointsMSELoss(use_target_weight=False)(output, target, target_weight)
    jax.block_until_ready(loss_nw)
    ref_nw = _ref_loss(output, target, None)
    assert abs(float(loss_nw) - float(ref_nw)) < 1e-5 * max(1.0, abs(float(ref_nw))), (
        float(loss_nw), float(ref_nw))

    # Case 2: bf16, HW = 1024 (exercises the lane-dense (tile_rows, 128) output
    # path, the in-kernel f32 upcast, and 16-row sublane packing for bf16).
    B2, J2, H2, W2 = 2, 4, 32, 32
    out_bf = jax.random.normal(k4, (B2, J2, H2, W2), jnp.float32).astype(jnp.bfloat16)
    tgt_bf = jax.random.normal(k5, (B2, J2, H2, W2), jnp.float32).astype(jnp.bfloat16)
    tw2 = jax.random.uniform(k6, (B2, J2, 1), jnp.float32)

    loss_bf = JointsMSELoss(use_target_weight=True)(out_bf, tgt_bf, tw2)
    jax.block_until_ready(loss_bf)
    ref_bf = _ref_loss(out_bf.astype(jnp.float32), tgt_bf.astype(jnp.float32), tw2)
    assert abs(float(loss_bf) - float(ref_bf)) < 1e-4 * max(1.0, abs(float(ref_bf))), (
        float(loss_bf), float(ref_bf))

    print("KERNEL_OK")
</pallas_src>

<mosaic_0001>
module attributes {stable_mosaic.version = 11 : i64} {
  func.func @_partial_sq_sum_kernel(%arg0: i32, %arg1: memref<8x256xf32, #tpu.memory_space<vmem>>, %arg2: memref<8x256xf32, #tpu.memory_space<vmem>>, %arg3: memref<8x1xf32, #tpu.memory_space<vmem>>) attributes {dimension_semantics = [#tpu.dimension_semantics<parallel>], iteration_bounds = array<i64: 1>, scalar_prefetch = 0 : i64, scratch_operands = 0 : i64, tpu.core_type = #tpu.core_type<tc>, window_params = [{transform_indices = @transform_0, window_bounds = array<i64: 8, 256>}, {transform_indices = @transform_1, window_bounds = array<i64: 8, 256>}, {transform_indices = @transform_2, window_bounds = array<i64: 8, 1>}]} {
    %c0 = arith.constant 0 : index
    %c0_0 = arith.constant 0 : index
    %0 = vector.load %arg1[%c0, %c0_0] : memref<8x256xf32, #tpu.memory_space<vmem>>, vector<8x256xf32>
    %c0_1 = arith.constant 0 : index
    %c0_2 = arith.constant 0 : index
    %1 = vector.load %arg2[%c0_1, %c0_2] : memref<8x256xf32, #tpu.memory_space<vmem>>, vector<8x256xf32>
    %2 = arith.subf %0, %1 : vector<8x256xf32>
    %3 = arith.mulf %2, %2 : vector<8x256xf32>
    %cst = arith.constant dense<0.000000e+00> : vector<8xf32>
    %4 = vector.multi_reduction <add>, %3, %cst [1] : vector<8x256xf32> to vector<8xf32>
    %5 = vector.shape_cast %4 : vector<8xf32> to vector<8x1xf32>
    %c0_3 = arith.constant 0 : index
    %c0_4 = arith.constant 0 : index
    %6 = vector.load %arg3[%c0_3, %c0_4] : memref<8x1xf32, #tpu.memory_space<vmem>>, vector<8x1xf32>
    tpu.vector_store %arg3[%c0_3, %c0_4], %5 {strides = array<i32>} : memref<8x1xf32, #tpu.memory_space<vmem>>, vector<8x1xf32>,
    return
  }
  func.func @transform_0(%arg0: i32) -> (i32, i32) {
    %c0_i32 = arith.constant 0 : i32
    %c0_i32_0 = arith.constant 0 : i32
    return %arg0, %c0_i32 : i32, i32
  }
  func.func @transform_1(%arg0: i32) -> (i32, i32) {
    %c0_i32 = arith.constant 0 : i32
    %c0_i32_0 = arith.constant 0 : i32
    return %arg0, %c0_i32 : i32, i32
  }
  func.func @transform_2(%arg0: i32) -> (i32, i32) {
    %c0_i32 = arith.constant 0 : i32
    %c0_i32_0 = arith.constant 0 : i32
    return %arg0, %c0_i32 : i32, i32
  }
}

</mosaic_0001>

<bundles_post_ra>
// kernel: tpu_custom_call.1
= control target key start
LH: loop header
LB: loop body
LE: loop exit
PB: predicated region body
PF: predicated region fallthrough
CT: control target
= control target key end

     0   :  { %7 = vsyncpa [#allocation3], 0  ;;  %s148_s0 = inlined_call_operand.hbm [shape: f32[8,256], index: 0, kind: input, shape index: {}]   ;;  %s149_s1 = inlined_call_operand.hbm [shape: f32[8,256], index: 1, kind: input, shape index: {}]   ;;  %s150_s2 = inlined_call_operand.vmem [shape: f32[8,1], index: 2, kind: output, shape index: {}]  }
   0x1   :  { %8 = vsyncpa [#allocation5], 0  ;;  %s104_s9 = smov [#allocation2]   ;;  %s105_s11 = smov [#allocation4]  }
   0x2   :  { %s15_s10 = sshll.u32 %s104_s9, 4  ;;  %s25_s12 = sshll.u32 %s105_s11, 4  ;;  %s16_s10 = int_to_ptr.vmem [resolvable:$true] %s15_s10  ;;  %s26_s12 = int_to_ptr.vmem [resolvable:$true] %s25_s12 }
   0x3   :  { %s56_s15 = scalar_lea.hbm %s148_s0, 256 }
   0x4   :  { %p57_p0 = scmp.ne.s32.totalorder %s148_s0, %s56_s15  ;;  %p60_p1 = scmp.lt.u32.totalorder %s56_s15, %s148_s0 }
   0x6   :  { %p62_p2 = pnand %p60_p1, %p57_p0 }
   0x8   :  { %65 = shalt.err (!%p62_p2)
}
   0x9   :  { %s66_s20 = scalar_lea.vmem %s16_s10, 256  ;;  %p71_p4 = scmp.lt.s32.totalorder %s16_s10, %s16_s10 }
   0xa   :  { %p67_p3 = scmp.ne.s32.totalorder %s16_s10, %s66_s20  ;;  %p72_p5 = scmp.lt.s32.totalorder %s66_s20, %s66_s20 }
   0xc   :  { %p73_p6 = por %p72_p5, %p71_p4 }
   0xe   :  { %p74_p7 = pnand %p73_p6, %p67_p3 }
  0x10   :  { %77 = shalt.err (!%p74_p7)
}
  0x11   :  { %18 = dma.hbm_to_vmem [thread:$0]  %s148_s0, 256, %s16_s10, [#allocation3]  }
  0x12   :  { %s78_s25 = scalar_lea.hbm %s149_s1, 256 }
  0x13   :  { %p79_p8 = scmp.ne.s32.totalorder %s149_s1, %s78_s25  ;;  %p82_p9 = scmp.lt.u32.totalorder %s78_s25, %s149_s1 }
  0x15   :  { %p84_p10 = pnand %p82_p9, %p79_p8 }
  0x17   :  { %87 = shalt.err (!%p84_p10)
}
  0x18   :  { %s88_s30 = scalar_lea.vmem %s26_s12, 256  ;;  %p93_p12 = scmp.lt.s32.totalorder %s26_s12, %s26_s12 }
  0x19   :  { %p89_p11 = scmp.ne.s32.totalorder %s26_s12, %s88_s30  ;;  %p94_p13 = scmp.lt.s32.totalorder %s88_s30, %s88_s30 }
  0x1b   :  { %p95_p0 = por %p94_p13, %p93_p12 }
  0x1d   :  { %p96_p1 = pnand %p95_p0, %p89_p11 }
  0x1f   :  { %99 = shalt.err (!%p96_p1)
}
  0x20   :  { %28 = dma.hbm_to_vmem [thread:$0]  %s149_s1, 256, %s26_s12, [#allocation5]  }
  0x21   :  { %100 = dma.done.wait [#allocation3], 256  }
  0x22   :  { %101 = vsyncadd [#allocation3], 4294967040 }
  0x23   :  { %102 = dma.done.wait [#allocation5], 256  }
  0x24   :  { %103 = vsyncadd [#allocation5], 4294967040  ;;  %v35_v0 = vld [vmem:[#allocation2] sm:$0xff]  ;;  %v36_v1 = vld [vmem:[#allocation2 + $0x8] sm:$0xff]  ;;  %vm46_vm0 = vcmask 7168  }
  0x25   :  { %v37_v2 = vld [vmem:[#allocation4] sm:$0xff]  ;;  %v38_v3 = vld [vmem:[#allocation4 + $0x8] sm:$0xff] }
  0x26   :  { %v39_v4 = vsub.f32 %v35_v0, %v37_v2  ;;  %v40_v5 = vsub.f32 %v36_v1, %v38_v3 }
  0x28   :  { %v41_v6 = vmul.f32 %v39_v4, %v39_v4  ;;  %v42_v7 = vmul.f32 %v40_v5, %v40_v5 }
  0x2a   :  { %v43_v8 = vadd.f32 %v42_v7, %v41_v6 }
  0x2c   :  { %44 = vadd.xlane.f32.xlu0 %v43_v8 }
  0xb9   :  { %v45_v9 = vpop.xlane.xlu0 %44 }
  0xba   :  { %47 = vst.msk [vmem:[%s150_s2] sm:$0xff] %vm46_vm0, %v45_v9 }
  0xbb   :  { %52 = vsyncpa [#allocation3], 1 }
  0xbc   :  { %53 = vsyncpa [#allocation5], 1 }

</bundles_post_ra>
